<compile_context>
chip_gen: v7x
topology: tpu7x:2x2x1
jax: 0.10.0
libtpu: 0.0.40
codegen_flags: <defaults>
</compile_context>

<pallas_src>
import functools

import numpy as np
import jax
import jax.numpy as jnp
from jax import lax
from jax.experimental import pallas as pl
from jax.experimental.pallas import tpu as pltpu


def _mask_pool_kernel(thr_ref, u_ref, o_ref, *, W, P, degenerate):
    """Threshold + (2P+1)x(2P+1), stride-1, 'same' max-pool for ALL slices at once.

    Lane-dense flat layout (N, L): N = B*T slices (sublanes), L = H*W lanes,
    lane index l = h*W + w. Zero is the identity for max over the binary mask,
    so zero-filled shifts reproduce F.max_pool2d's implicit -inf padding.
    """
    N, L = u_ref.shape
    u = u_ref[...]
    m = (u < thr_ref[0]).astype(jnp.float32)            # binary mask in {0, 1}

    if degenerate:
        # P >= image_size - 1: every pooling window covers the whole image, so the
        # pool is just a per-slice global max broadcast to every pixel.
        o_ref[...] = jnp.broadcast_to(jnp.max(m, axis=1, keepdims=True), (N, L))
        return

    # Column index (w) of every lane — hoisted out of the pooling loops.
    wpos = lax.broadcasted_iota(jnp.int32, (N, L), 1) % W

    def lane_shift(a, s):
        # result[:, l] = a[:, l + s], zero-filled outside [0, L). s is static.
        if s == 0:
            return a
        if abs(s) >= L:
            return jnp.zeros_like(a)
        pad = jnp.zeros((N, abs(s)), a.dtype)
        if s > 0:
            return jnp.concatenate([a[:, s:], pad], axis=1)
        return jnp.concatenate([pad, a[:, :L + s]], axis=1)

    def shift_rows(a, s):
        # Shift by whole H-rows: same column, rows outside [0, H) land outside
        # [0, L) and are zero-filled -> no extra mask needed.
        return lane_shift(a, s * W)

    def shift_cols(a, s):
        # Shift within each W-row; zero lanes whose source crossed a row boundary.
        if abs(s) >= W:
            return jnp.zeros_like(a)
        shifted = lane_shift(a, s)
        if s > 0:
            return jnp.where(wpos < W - s, shifted, 0.0)
        return jnp.where(wpos >= -s, shifted, 0.0)

    def pool_axis(a, shift_fn):
        # Centered running max of radius P along one axis: one-sided window of
        # length Q = P+1 in each direction via log2 doubling, then combine.
        Q = P + 1

        def one_sided(sign):
            r = a
            p = 1
            while 2 * p <= Q:
                r = jnp.maximum(r, shift_fn(r, sign * p))
                p *= 2
            if Q > p:
                r = jnp.maximum(r, shift_fn(r, sign * (Q - p)))
            return r

        return jnp.maximum(one_sided(1), one_sided(-1))

    out = pool_axis(m, shift_rows)       # dilate along H
    out = pool_axis(out, shift_cols)     # dilate along W
    o_ref[...] = out


def square_mask_from_uniform(u, mask_scale, threshold, n_levels=13):
    """Pallas equivalent of SquareMaskGenerator.forward given the U[0,1) samples.

    u: (B, T, H, W) iid uniforms (torch.rand equivalent).
    """
    B, T, H, W = u.shape
    K = mask_scale + 1                   # odd pooling kernel
    P = K // 2                           # 'same' padding
    N, L = B * T, H * W

    thr_eff = jnp.array([threshold / (mask_scale * 2) ** 2], dtype=jnp.float32)
    degenerate = P >= max(H, W) - 1      # static: pool == per-slice global max

    kernel = functools.partial(_mask_pool_kernel, W=W, P=P, degenerate=degenerate)
    mask2d = pl.pallas_call(
        kernel,
        out_shape=jax.ShapeDtypeStruct((N, L), jnp.float32),
        grid=(1,),                       # single invocation: no per-(b,t) grid overhead
        in_specs=[
            pl.BlockSpec(memory_space=pltpu.MemorySpace.SMEM),   # thr_eff (1,) f32
            pl.BlockSpec((N, L), lambda i: (0, 0)),              # uniforms, lane-dense
        ],
        out_specs=pl.BlockSpec((N, L), lambda i: (0, 0)),
    )(thr_eff, u.reshape(N, L))

    mask4d = mask2d.reshape(B, T, H, W)
    # torch: mask.unsqueeze(1).expand(-1, 13, -1, -1, -1) -> lazy broadcast.
    return jnp.broadcast_to(mask4d[:, None], (B, n_levels, T, H, W))


def square_mask_generator(key, train_bs, time_span, image_size,
                          mask_scale, threshold, n_levels=13):
    """Full forward: draw uniforms with jax.random, then threshold + pool + expand."""
    # TODO(synk): torch.rand bit-exactness is not reproducible; iid U[0,1) semantics
    # are preserved via jax.random (the np.random draws of mask_scale / threshold stay
    # host-side, exactly like the torch module).
    u = jax.random.uniform(
        key, (train_bs, time_span, image_size, image_size), dtype=jnp.float32)
    return square_mask_from_uniform(u, mask_scale, threshold, n_levels)


def _reference(u, mask_scale, threshold, n_levels=13):
    """Pure-JAX reference: threshold + lax.reduce_window max-pool + expand."""
    B, T, H, W = u.shape
    K = mask_scale + 1
    P = K // 2
    m = (u < threshold / (mask_scale * 2) ** 2).astype(jnp.float32)
    pooled = lax.reduce_window(
        m, -jnp.inf, lax.max,
        window_dimensions=(1, 1, K, K),
        window_strides=(1, 1, 1, 1),
        padding=((0, 0), (0, 0), (P, P), (P, P)))
    return jnp.broadcast_to(pooled[:, None], (B, n_levels, T, H, W))


if __name__ == "__main__":
    key = jax.random.PRNGKey(0)
    k_module, k_check = jax.random.split(key)

    # Host-side randoms, exactly like the torch module's np.random calls.
    rng = np.random.RandomState(0)
    mask_scale = int(rng.choice([16, 32, 64]))
    threshold = float(rng.uniform(low=0.1, high=0.25))

    train_bs, time_span, image_size = 2, 8, 16   # args.train_bs / time_span / image_size

    # 1) Module-faithful call (this RandomState draw gives mask_scale=32 -> global-max path).
    mask = square_mask_generator(k_module, train_bs, time_span, image_size,
                                 mask_scale, threshold)
    jax.block_until_ready(mask)
    assert mask.shape == (train_bs, 13, time_span, image_size, image_size)
    assert mask.dtype == jnp.float32
    assert bool(jnp.all((mask == 0.0) | (mask == 1.0)))

    # 2) Correctness of the general (shift-doubling) pooling path vs reduce_window,
    #    with an inflated threshold so the dilation acts on a well-populated mask.
    u = jax.random.uniform(
        k_check, (train_bs, time_span, image_size, image_size), dtype=jnp.float32)
    got = square_mask_from_uniform(u, mask_scale=16, threshold=20.0)
    ref = _reference(u, mask_scale=16, threshold=20.0)
    jax.block_until_ready(got)
    assert bool(jnp.array_equal(got, ref))

    # 3) Correctness of the degenerate (global-max) path on a populated mask.
    got = square_mask_from_uniform(u, mask_scale=32, threshold=80.0)
    ref = _reference(u, mask_scale=32, threshold=80.0)
    jax.block_until_ready(got)
    assert bool(jnp.array_equal(got, ref))

    print("KERNEL_OK")
</pallas_src>

<mosaic_0001>
module attributes {stable_mosaic.version = 11 : i64} {
  func.func @_mask_pool_kernel(%arg0: i32, %arg1: memref<1xf32, #tpu.memory_space<smem>>, %arg2: memref<16x256xf32, #tpu.memory_space<vmem>>, %arg3: memref<16x256xf32, #tpu.memory_space<vmem>>) attributes {dimension_semantics = [#tpu.dimension_semantics<arbitrary>], iteration_bounds = array<i64: 1>, scalar_prefetch = 0 : i64, scratch_operands = 0 : i64, tpu.core_type = #tpu.core_type<tc>, window_params = [{transform_indices = @transform_0, window_bounds = array<i64: 1>}, {pipeline_mode = #tpu.pipeline_mode<synchronous>, transform_indices = @transform_1, window_bounds = array<i64: 16, 256>}, {pipeline_mode = #tpu.pipeline_mode<synchronous>, transform_indices = @transform_2, window_bounds = array<i64: 16, 256>}]} {
    %c0 = arith.constant 0 : index
    %c0_0 = arith.constant 0 : index
    %0 = vector.load %arg2[%c0, %c0_0] : memref<16x256xf32, #tpu.memory_space<vmem>>, vector<16x256xf32>
    %c0_1 = arith.constant 0 : index
    %1 = memref.load %arg1[%c0_1] : memref<1xf32, #tpu.memory_space<smem>>
    %2 = vector.broadcast %1 : f32 to vector<16x256xf32>
    %3 = arith.cmpf olt, %0, %2 : vector<16x256xf32>
    %4 = arith.extui %3 : vector<16x256xi1> to vector<16x256xi32>
    %5 = arith.sitofp %4 : vector<16x256xi32> to vector<16x256xf32>
    %6 = tpu.iota {dimensions = array<i32: 1>} : vector<16x256xi32>
    %c16_i32 = arith.constant 16 : i32
    %c0_i32 = arith.constant 0 : i32
    %7 = arith.cmpi eq, %c16_i32, %c0_i32 : i32
    %c1_i32 = arith.constant 1 : i32
    %8 = arith.select %7, %c1_i32, %c16_i32 : i32
    %9 = vector.broadcast %8 : i32 to vector<16x256xi32>
    %10 = arith.remsi %6, %9 : vector<16x256xi32>
    %c0_i32_2 = arith.constant 0 : i32
    %11 = vector.broadcast %c0_i32_2 : i32 to vector<16x256xi32>
    %12 = arith.cmpi ne, %10, %11 : vector<16x256xi32>
    %c0_i32_3 = arith.constant 0 : i32
    %13 = vector.broadcast %c0_i32_3 : i32 to vector<16x256xi32>
    %14 = arith.cmpi slt, %10, %13 : vector<16x256xi32>
    %c0_i32_4 = arith.constant 0 : i32
    %15 = arith.cmpi slt, %8, %c0_i32_4 : i32
    %16 = vector.broadcast %15 : i1 to vector<16x256xi1>
    %17 = vector.broadcast %16 : vector<16x256xi1> to vector<16x256xi1>
    %18 = arith.xori %14, %17 : vector<16x256xi1>
    %19 = arith.andi %18, %12 : vector<16x256xi1>
    %20 = vector.broadcast %8 : i32 to vector<16x256xi32>
    %21 = arith.addi %10, %20 : vector<16x256xi32>
    %22 = arith.select %19, %21, %10 : vector<16x256xi1>, vector<16x256xi32>
    %cst = arith.constant 0.000000e+00 : f32
    %23 = vector.broadcast %cst : f32 to vector<16x16xf32>
    %24 = vector.extract_strided_slice %5 {offsets = [0, 16], sizes = [16, 240], strides = [1, 1]} : vector<16x256xf32> to vector<16x240xf32>
    %25 = tpu.concatenate %24, %23 in 1 : vector<16x240xf32>, vector<16x16xf32> -> vector<16x256xf32>
    %26 = arith.maximumf %5, %25 : vector<16x256xf32>
    %cst_5 = arith.constant 0.000000e+00 : f32
    %27 = vector.broadcast %cst_5 : f32 to vector<16x32xf32>
    %28 = vector.extract_strided_slice %26 {offsets = [0, 32], sizes = [16, 224], strides = [1, 1]} : vector<16x256xf32> to vector<16x224xf32>
    %29 = tpu.concatenate %28, %27 in 1 : vector<16x224xf32>, vector<16x32xf32> -> vector<16x256xf32>
    %30 = arith.maximumf %26, %29 : vector<16x256xf32>
    %cst_6 = arith.constant 0.000000e+00 : f32
    %31 = vector.broadcast %cst_6 : f32 to vector<16x64xf32>
    %32 = vector.extract_strided_slice %30 {offsets = [0, 64], sizes = [16, 192], strides = [1, 1]} : vector<16x256xf32> to vector<16x192xf32>
    %33 = tpu.concatenate %32, %31 in 1 : vector<16x192xf32>, vector<16x64xf32> -> vector<16x256xf32>
    %34 = arith.maximumf %30, %33 : vector<16x256xf32>
    %cst_7 = arith.constant 0.000000e+00 : f32
    %35 = vector.broadcast %cst_7 : f32 to vector<16x16xf32>
    %36 = vector.extract_strided_slice %34 {offsets = [0, 16], sizes = [16, 240], strides = [1, 1]} : vector<16x256xf32> to vector<16x240xf32>
    %37 = tpu.concatenate %36, %35 in 1 : vector<16x240xf32>, vector<16x16xf32> -> vector<16x256xf32>
    %38 = arith.maximumf %34, %37 : vector<16x256xf32>
    %cst_8 = arith.constant 0.000000e+00 : f32
    %39 = vector.broadcast %cst_8 : f32 to vector<16x16xf32>
    %40 = vector.extract_strided_slice %5 {offsets = [0, 0], sizes = [16, 240], strides = [1, 1]} : vector<16x256xf32> to vector<16x240xf32>
    %41 = tpu.concatenate %39, %40 in 1 : vector<16x16xf32>, vector<16x240xf32> -> vector<16x256xf32>
    %42 = arith.maximumf %5, %41 : vector<16x256xf32>
    %cst_9 = arith.constant 0.000000e+00 : f32
    %43 = vector.broadcast %cst_9 : f32 to vector<16x32xf32>
    %44 = vector.extract_strided_slice %42 {offsets = [0, 0], sizes = [16, 224], strides = [1, 1]} : vector<16x256xf32> to vector<16x224xf32>
    %45 = tpu.concatenate %43, %44 in 1 : vector<16x32xf32>, vector<16x224xf32> -> vector<16x256xf32>
    %46 = arith.maximumf %42, %45 : vector<16x256xf32>
    %cst_10 = arith.constant 0.000000e+00 : f32
    %47 = vector.broadcast %cst_10 : f32 to vector<16x64xf32>
    %48 = vector.extract_strided_slice %46 {offsets = [0, 0], sizes = [16, 192], strides = [1, 1]} : vector<16x256xf32> to vector<16x192xf32>
    %49 = tpu.concatenate %47, %48 in 1 : vector<16x64xf32>, vector<16x192xf32> -> vector<16x256xf32>
    %50 = arith.maximumf %46, %49 : vector<16x256xf32>
    %cst_11 = arith.constant 0.000000e+00 : f32
    %51 = vector.broadcast %cst_11 : f32 to vector<16x16xf32>
    %52 = vector.extract_strided_slice %50 {offsets = [0, 0], sizes = [16, 240], strides = [1, 1]} : vector<16x256xf32> to vector<16x240xf32>
    %53 = tpu.concatenate %51, %52 in 1 : vector<16x16xf32>, vector<16x240xf32> -> vector<16x256xf32>
    %54 = arith.maximumf %50, %53 : vector<16x256xf32>
    %55 = arith.maximumf %38, %54 : vector<16x256xf32>
    %cst_12 = arith.constant 0.000000e+00 : f32
    %56 = vector.broadcast %cst_12 : f32 to vector<16x1xf32>
    %57 = vector.extract_strided_slice %55 {offsets = [0, 1], sizes = [16, 255], strides = [1, 1]} : vector<16x256xf32> to vector<16x255xf32>
    %58 = tpu.concatenate %57, %56 in 1 : vector<16x255xf32>, vector<16x1xf32> -> vector<16x256xf32>
    %c15_i32 = arith.constant 15 : i32
    %59 = vector.broadcast %c15_i32 : i32 to vector<16x256xi32>
    %60 = arith.cmpi slt, %22, %59 : vector<16x256xi32>
    %cst_13 = arith.constant 0.000000e+00 : f32
    %61 = vector.broadcast %cst_13 : f32 to vector<16x256xf32>
    %62 = arith.select %60, %58, %61 : vector<16x256xi1>, vector<16x256xf32>
    %63 = arith.maximumf %55, %62 : vector<16x256xf32>
    %cst_14 = arith.constant 0.000000e+00 : f32
    %64 = vector.broadcast %cst_14 : f32 to vector<16x2xf32>
    %65 = vector.extract_strided_slice %63 {offsets = [0, 2], sizes = [16, 254], strides = [1, 1]} : vector<16x256xf32> to vector<16x254xf32>
    %66 = tpu.concatenate %65, %64 in 1 : vector<16x254xf32>, vector<16x2xf32> -> vector<16x256xf32>
    %c14_i32 = arith.constant 14 : i32
    %67 = vector.broadcast %c14_i32 : i32 to vector<16x256xi32>
    %68 = arith.cmpi slt, %22, %67 : vector<16x256xi32>
    %cst_15 = arith.constant 0.000000e+00 : f32
    %69 = vector.broadcast %cst_15 : f32 to vector<16x256xf32>
    %70 = arith.select %68, %66, %69 : vector<16x256xi1>, vector<16x256xf32>
    %71 = arith.maximumf %63, %70 : vector<16x256xf32>
    %cst_16 = arith.constant 0.000000e+00 : f32
    %72 = vector.broadcast %cst_16 : f32 to vector<16x4xf32>
    %73 = vector.extract_strided_slice %71 {offsets = [0, 4], sizes = [16, 252], strides = [1, 1]} : vector<16x256xf32> to vector<16x252xf32>
    %74 = tpu.concatenate %73, %72 in 1 : vector<16x252xf32>, vector<16x4xf32> -> vector<16x256xf32>
    %c12_i32 = arith.constant 12 : i32
    %75 = vector.broadcast %c12_i32 : i32 to vector<16x256xi32>
    %76 = arith.cmpi slt, %22, %75 : vector<16x256xi32>
    %cst_17 = arith.constant 0.000000e+00 : f32
    %77 = vector.broadcast %cst_17 : f32 to vector<16x256xf32>
    %78 = arith.select %76, %74, %77 : vector<16x256xi1>, vector<16x256xf32>
    %79 = arith.maximumf %71, %78 : vector<16x256xf32>
    %cst_18 = arith.constant 0.000000e+00 : f32
    %80 = vector.broadcast %cst_18 : f32 to vector<16x1xf32>
    %81 = vector.extract_strided_slice %79 {offsets = [0, 1], sizes = [16, 255], strides = [1, 1]} : vector<16x256xf32> to vector<16x255xf32>
    %82 = tpu.concatenate %81, %80 in 1 : vector<16x255xf32>, vector<16x1xf32> -> vector<16x256xf32>
    %c15_i32_19 = arith.constant 15 : i32
    %83 = vector.broadcast %c15_i32_19 : i32 to vector<16x256xi32>
    %84 = arith.cmpi slt, %22, %83 : vector<16x256xi32>
    %cst_20 = arith.constant 0.000000e+00 : f32
    %85 = vector.broadcast %cst_20 : f32 to vector<16x256xf32>
    %86 = arith.select %84, %82, %85 : vector<16x256xi1>, vector<16x256xf32>
    %87 = arith.maximumf %79, %86 : vector<16x256xf32>
    %cst_21 = arith.constant 0.000000e+00 : f32
    %88 = vector.broadcast %cst_21 : f32 to vector<16x1xf32>
    %89 = vector.extract_strided_slice %55 {offsets = [0, 0], sizes = [16, 255], strides = [1, 1]} : vector<16x256xf32> to vector<16x255xf32>
    %90 = tpu.concatenate %88, %89 in 1 : vector<16x1xf32>, vector<16x255xf32> -> vector<16x256xf32>
    %c1_i32_22 = arith.constant 1 : i32
    %91 = vector.broadcast %c1_i32_22 : i32 to vector<16x256xi32>
    %92 = arith.cmpi sge, %22, %91 : vector<16x256xi32>
    %cst_23 = arith.constant 0.000000e+00 : f32
    %93 = vector.broadcast %cst_23 : f32 to vector<16x256xf32>
    %94 = arith.select %92, %90, %93 : vector<16x256xi1>, vector<16x256xf32>
    %95 = arith.maximumf %55, %94 : vector<16x256xf32>
    %cst_24 = arith.constant 0.000000e+00 : f32
    %96 = vector.broadcast %cst_24 : f32 to vector<16x2xf32>
    %97 = vector.extract_strided_slice %95 {offsets = [0, 0], sizes = [16, 254], strides = [1, 1]} : vector<16x256xf32> to vector<16x254xf32>
    %98 = tpu.concatenate %96, %97 in 1 : vector<16x2xf32>, vector<16x254xf32> -> vector<16x256xf32>
    %c2_i32 = arith.constant 2 : i32
    %99 = vector.broadcast %c2_i32 : i32 to vector<16x256xi32>
    %100 = arith.cmpi sge, %22, %99 : vector<16x256xi32>
    %cst_25 = arith.constant 0.000000e+00 : f32
    %101 = vector.broadcast %cst_25 : f32 to vector<16x256xf32>
    %102 = arith.select %100, %98, %101 : vector<16x256xi1>, vector<16x256xf32>
    %103 = arith.maximumf %95, %102 : vector<16x256xf32>
    %cst_26 = arith.constant 0.000000e+00 : f32
    %104 = vector.broadcast %cst_26 : f32 to vector<16x4xf32>
    %105 = vector.extract_strided_slice %103 {offsets = [0, 0], sizes = [16, 252], strides = [1, 1]} : vector<16x256xf32> to vector<16x252xf32>
    %106 = tpu.concatenate %104, %105 in 1 : vector<16x4xf32>, vector<16x252xf32> -> vector<16x256xf32>
    %c4_i32 = arith.constant 4 : i32
    %107 = vector.broadcast %c4_i32 : i32 to vector<16x256xi32>
    %108 = arith.cmpi sge, %22, %107 : vector<16x256xi32>
    %cst_27 = arith.constant 0.000000e+00 : f32
    %109 = vector.broadcast %cst_27 : f32 to vector<16x256xf32>
    %110 = arith.select %108, %106, %109 : vector<16x256xi1>, vector<16x256xf32>
    %111 = arith.maximumf %103, %110 : vector<16x256xf32>
    %cst_28 = arith.constant 0.000000e+00 : f32
    %112 = vector.broadcast %cst_28 : f32 to vector<16x1xf32>
    %113 = vector.extract_strided_slice %111 {offsets = [0, 0], sizes = [16, 255], strides = [1, 1]} : vector<16x256xf32> to vector<16x255xf32>
    %114 = tpu.concatenate %112, %113 in 1 : vector<16x1xf32>, vector<16x255xf32> -> vector<16x256xf32>
    %c1_i32_29 = arith.constant 1 : i32
    %115 = vector.broadcast %c1_i32_29 : i32 to vector<16x256xi32>
    %116 = arith.cmpi sge, %22, %115 : vector<16x256xi32>
    %cst_30 = arith.constant 0.000000e+00 : f32
    %117 = vector.broadcast %cst_30 : f32 to vector<16x256xf32>
    %118 = arith.select %116, %114, %117 : vector<16x256xi1>, vector<16x256xf32>
    %119 = arith.maximumf %111, %118 : vector<16x256xf32>
    %120 = arith.maximumf %87, %119 : vector<16x256xf32>
    %c0_31 = arith.constant 0 : index
    %c0_32 = arith.constant 0 : index
    %121 = vector.load %arg3[%c0_31, %c0_32] : memref<16x256xf32, #tpu.memory_space<vmem>>, vector<16x256xf32>
    tpu.vector_store %arg3[%c0_31, %c0_32], %120 {strides = array<i32>} : memref<16x256xf32, #tpu.memory_space<vmem>>, vector<16x256xf32>,
    return
  }
  func.func @transform_0(%arg0: i32) -> i32 {
    %c0_i32 = arith.constant 0 : i32
    %c0_i32_0 = arith.constant 0 : i32
    return %c0_i32 : i32
  }
  func.func @transform_1(%arg0: i32) -> (i32, i32) {
    %c0_i32 = arith.constant 0 : i32
    %c0_i32_0 = arith.constant 0 : i32
    %c0_i32_1 = arith.constant 0 : i32
    return %c0_i32, %c0_i32_0 : i32, i32
  }
  func.func @transform_2(%arg0: i32) -> (i32, i32) {
    %c0_i32 = arith.constant 0 : i32
    %c0_i32_0 = arith.constant 0 : i32
    %c0_i32_1 = arith.constant 0 : i32
    return %c0_i32, %c0_i32_0 : i32, i32
  }
}

</mosaic_0001>

<bundles_post_ra>
// kernel: tpu_custom_call.1
= control target key start
LH: loop header
LB: loop body
LE: loop exit
PB: predicated region body
PF: predicated region fallthrough
CT: control target
= control target key end

     0   :  { %8 = vsyncpa [#allocation4], 0  ;;  %s990_s0 = inlined_call_operand.<no memory space> [shape: f32[1], index: 0, kind: input, shape index: {}]   ;;  %s991_s1 = inlined_call_operand.hbm [shape: f32[16,256], index: 1, kind: input, shape index: {}]   ;;  %s992_s2 = inlined_call_operand.hbm [shape: f32[16,256], index: 2, kind: output, shape index: {}]  }
   0x1   :  { %9 = vsyncpa [#allocation5], 0  ;;  %s759_s9 = smov [#allocation3]   ;;  %s711_s13 = scalar_lea.hbm %s991_s1, 512 }
   0x2   :  { %s17_s10 = sshll.u32 %s759_s9, 4  ;;  %p712_p0 = scmp.ne.s32.totalorder %s991_s1, %s711_s13  ;;  %s18_s10 = int_to_ptr.vmem [resolvable:$true] %s17_s10 }
   0x3   :  { %p715_p1 = scmp.lt.u32.totalorder %s711_s13, %s991_s1 }
   0x5   :  { %p717_p2 = pnand %p715_p1, %p712_p0 }
   0x7   :  { %720 = shalt.err (!%p717_p2)
}
   0x8   :  { %s721_s18 = scalar_lea.vmem %s18_s10, 512  ;;  %p726_p4 = scmp.lt.s32.totalorder %s18_s10, %s18_s10 }
   0x9   :  { %p722_p3 = scmp.ne.s32.totalorder %s18_s10, %s721_s18  ;;  %p727_p5 = scmp.lt.s32.totalorder %s721_s18, %s721_s18 }
   0xb   :  { %p728_p6 = por %p727_p5, %p726_p4 }
   0xd   :  { %p729_p7 = pnand %p728_p6, %p722_p3 }
   0xf   :  { %732 = shalt.err (!%p729_p7)
}
  0x10   :  { %s760_s19 = smov 256   ;;  %s761_s20 = smov 16  }
  0x11   :  { %23 = dma.hbm_to_vmem [thread:$0]  %s991_s1, 512, %s18_s10, [#allocation4], %s760_s19, %s760_s19, %s761_s20  }
  0x12   :  { %755 = dma.done.wait [#allocation4], 512  }
  0x13   :  { %756 = vsyncadd [#allocation4], 4294966784  ;;  %v32_v0 = vstv %s990_s0  ;;  %v27_v1 = vld [vmem:[#allocation3] sm:$0xff]  ;;  %v28_v2 = vld [vmem:[#allocation3 + $0x8] sm:$0xff]  ;;  %v762_v5 = vmov 0.0   ;;  %s763_s1 = smov 112  }
  0x14   :  { %v29_v3 = vld [vmem:[#allocation3 + $0x10] sm:$0xff]  ;;  %vm33_vm0 = vcmp.lt.f32.partialorder %v27_v1, %v32_v0  ;;  %vm34_vm1 = vcmp.lt.f32.partialorder %v28_v2, %v32_v0  ;;  %v30_v4 = vld [vmem:[#allocation3 + $0x18] sm:$0xff]  ;;  %vm84_vm4 = vcmask 916480   ;;  %vm179_vm5 = vcmask 130048   ;;  %s764_s0 = smov 96   ;;  %s765_s25 = smov 32  }
  0x15   :  { %vm35_vm2 = vcmp.lt.f32.partialorder %v29_v3, %v32_v0  ;;  %v532_v6 = vsel %vm33_vm0, 1.0, %v762_v5  ;;  %v533_v7 = vsel %vm34_vm1, 1.0, %v762_v5  ;;  %vm36_vm3 = vcmp.lt.f32.partialorder %v30_v4, %v32_v0  ;;  %s766_s26 = smov 64   ;;  %s767_s27 = smov 127  }
  0x16   :  { %v534_v8 = vsel %vm35_vm2, 1.0, %v762_v5  ;;  %v551_v9 = vpack.i.bf16 %v533_v7, %v532_v6  ;;  %v535_v10 = vsel %vm36_vm3, 1.0, %v762_v5  ;;  %vm109_vm6 = vcmask 785408   ;;  %s768_s28 = smov 1   ;;  %s769_s29 = smov 126  }
  0x17   :  { %v556_v11 = vpack.i.bf16 %v535_v10, %v534_v8  ;;  %vm204_vm7 = vcmask 261120   ;;  %vm134_vm8 = vcmask 523264   ;;  %vm281_vm9 = vcmask 1039360   ;;  %s770_s30 = smov 2   ;;  %s771_s3 = smov 124  }
  0x18   :  { %552 = vrot.lane.b32.xlu0 %v551_v9, %s763_s1  ;;  %562 = vrot.lane.b32.xlu1 %v551_v9, %s761_s20  ;;  %vm398_vm12 = vcmask 7168   ;;  %vm312_vm15 = vcmask 1031168   ;;  %vm429_vm2 = vcmask 15360   ;;  %s772_s4 = smov 4   ;;  %s773_s5 = smov [#allocation6]  }
  0x19   :  { %s520_s6 = sshll.u32 %s773_s5, 4  ;;  %s521_s6 = int_to_ptr.vmem [resolvable:$true] %s520_s6 }
  0x1a   :  { %s733_s7 = scalar_lea.vmem %s521_s6, 512  ;;  %p738_p9 = scmp.lt.s32.totalorder %s521_s6, %s521_s6 }
  0x1b   :  { %p734_p8 = scmp.ne.s32.totalorder %s521_s6, %s733_s7  ;;  %p739_p10 = scmp.lt.s32.totalorder %s733_s7, %s733_s7 }
  0x1c   :  { %557 = vrot.lane.b32.xlu0 %v556_v11, %s763_s1  ;;  %567 = vrot.lane.b32.xlu1 %v556_v11, %s761_s20 }
  0x1d   :  { %p740_p11 = por %p739_p10, %p738_p9 }
  0x1f   :  { %p741_p12 = pnand %p740_p11, %p734_p8 }
  0x8a   :  { %v553_v12 = vpop.permute.xlu0 %552  ;;  %v563_v13 = vpop.permute.xlu1 %562 }
  0x8b   :  { %v555_v14 = vunpack.i.h.bf16 %v553_v12  ;;  %v554_v15 = vunpack.i.l.bf16 %v553_v12  ;;  %v565_v16 = vunpack.i.h.bf16 %v563_v13  ;;  %v564_v17 = vunpack.i.l.bf16 %v563_v13 }
  0x8d   :  { %v91_v18 = vsel %vm84_vm4, %v555_v14, 0.0  ;;  %v85_v19 = vsel %vm84_vm4, %v554_v15, %v555_v14  ;;  %v180_v20 = vsel %vm179_vm5, %v564_v17, %v565_v16  ;;  %v186_v21 = vsel %vm179_vm5, 0.0, %v564_v17 }
  0x8e   :  { %v94_v22 = vmax.f32 %v533_v7, %v91_v18  ;;  %v188_v23 = vmax.f32 %v532_v6, %v186_v21  ;;  %v558_v24 = vpop.permute.xlu0 %557  ;;  %v568_v25 = vpop.permute.xlu1 %567  ;;  %v93_v26 = vmax.f32 %v532_v6, %v85_v19  ;;  %v189_v27 = vmax.f32 %v533_v7, %v180_v20 }
  0x8f   :  { %v560_v28 = vunpack.i.h.bf16 %v558_v24  ;;  %v559_v29 = vunpack.i.l.bf16 %v558_v24  ;;  %v570_v30 = vunpack.i.h.bf16 %v568_v25  ;;  %v569_v31 = vunpack.i.l.bf16 %v568_v25 }
  0x90   :  { %v571_v32 = vpack.i.bf16 %v94_v22, %v93_v26  ;;  %v581_v33 = vpack.i.bf16 %v189_v27, %v188_v23 }
  0x91   :  { %v92_v34 = vsel %vm84_vm4, %v560_v28, 0.0  ;;  %v86_v35 = vsel %vm84_vm4, %v559_v29, %v560_v28  ;;  %v181_v36 = vsel %vm179_vm5, %v569_v31, %v570_v30  ;;  %v187_v37 = vsel %vm179_vm5, 0.0, %v569_v31 }
  0x92   :  { %v96_v38 = vmax.f32 %v535_v10, %v92_v34  ;;  %v190_v39 = vmax.f32 %v534_v8, %v187_v37  ;;  %572 = vrot.lane.b32.xlu0 %v571_v32, %s764_s0  ;;  %v95_v40 = vmax.f32 %v534_v8, %v86_v35  ;;  %v191_v41 = vmax.f32 %v535_v10, %v181_v36 }
  0x94   :  { %v576_v42 = vpack.i.bf16 %v96_v38, %v95_v40  ;;  %v586_v43 = vpack.i.bf16 %v191_v41, %v190_v39 }
  0x96   :  { %577 = vrot.lane.b32.xlu1 %v576_v42, %s764_s0  ;;  %582 = vrot.lane.b32.xlu0 %v581_v33, %s765_s25 }
  0x9a   :  { %587 = vrot.lane.b32.xlu1 %v586_v43, %s765_s25 }
 0x104   :  { %v573_v44 = vpop.permute.xlu0 %572 }
 0x105   :  { %v575_v45 = vunpack.i.h.bf16 %v573_v44  ;;  %v574_v46 = vunpack.i.l.bf16 %v573_v44 }
 0x107   :  { %v116_v47 = vsel %vm109_vm6, %v575_v45, 0.0  ;;  %v110_v48 = vsel %vm109_vm6, %v574_v46, %v575_v45 }
 0x108   :  { %v119_v49 = vmax.f32 %v94_v22, %v116_v47  ;;  %v578_v50 = vpop.permute.xlu1 %577  ;;  %v583_v51 = vpop.permute.xlu0 %582  ;;  %v118_v52 = vmax.f32 %v93_v26, %v110_v48 }
 0x109   :  { %v580_v53 = vunpack.i.h.bf16 %v578_v50  ;;  %v579_v54 = vunpack.i.l.bf16 %v578_v50  ;;  %v585_v55 = vunpack.i.h.bf16 %v583_v51  ;;  %v584_v56 = vunpack.i.l.bf16 %v583_v51 }
 0x10a   :  { %v591_v57 = vpack.i.bf16 %v119_v49, %v118_v52 }
 0x10b   :  { %v117_v58 = vsel %vm109_vm6, %v580_v53, 0.0  ;;  %v111_v59 = vsel %vm109_vm6, %v579_v54, %v580_v53  ;;  %v205_v60 = vsel %vm204_vm7, %v584_v56, %v585_v55  ;;  %v211_v61 = vsel %vm204_vm7, 0.0, %v584_v56 }
 0x10c   :  { %v121_v62 = vmax.f32 %v96_v38, %v117_v58  ;;  %v213_v63 = vmax.f32 %v188_v23, %v211_v61  ;;  %v588_v0 = vpop.permute.xlu1 %587  ;;  %592 = vrot.lane.b32.xlu0 %v591_v57, %s766_s26  ;;  %v120_v1 = vmax.f32 %v95_v40, %v111_v59  ;;  %v214_v2 = vmax.f32 %v189_v27, %v205_v60 }
 0x10d   :  { %v590_v3 = vunpack.i.h.bf16 %v588_v0  ;;  %v589_v4 = vunpack.i.l.bf16 %v588_v0 }
 0x10e   :  { %v596_v5 = vpack.i.bf16 %v121_v62, %v120_v1  ;;  %v601_v6 = vpack.i.bf16 %v214_v2, %v213_v63 }
 0x10f   :  { %v206_v7 = vsel %vm204_vm7, %v589_v4, %v590_v3  ;;  %v212_v8 = vsel %vm204_vm7, 0.0, %v589_v4 }
 0x110   :  { %v215_v9 = vmax.f32 %v190_v39, %v212_v8  ;;  %597 = vrot.lane.b32.xlu1 %v596_v5, %s766_s26  ;;  %602 = vrot.lane.b32.xlu0 %v601_v6, %s766_s26  ;;  %v216_v10 = vmax.f32 %v191_v41, %v206_v7 }
 0x112   :  { %v606_v11 = vpack.i.bf16 %v216_v10, %v215_v9 }
 0x114   :  { %607 = vrot.lane.b32.xlu1 %v606_v11, %s766_s26 }
 0x17e   :  { %v593_v12 = vpop.permute.xlu0 %592 }
 0x17f   :  { %v595_v13 = vunpack.i.h.bf16 %v593_v12  ;;  %v594_v14 = vunpack.i.l.bf16 %v593_v12 }
 0x181   :  { %v141_v15 = vsel %vm134_vm8, %v595_v13, 0.0  ;;  %v135_v16 = vsel %vm134_vm8, %v594_v14, %v595_v13  ;;  %v45_v14 = vlaneseq }
 0x182   :  { %v144_v17 = vmax.f32 %v119_v49, %v141_v15  ;;  %v598_v18 = vpop.permute.xlu1 %597  ;;  %v603_v19 = vpop.permute.xlu0 %602  ;;  %v143_v20 = vmax.f32 %v118_v52, %v135_v16 }
 0x183   :  { %v600_v21 = vunpack.i.h.bf16 %v598_v18  ;;  %v599_v22 = vunpack.i.l.bf16 %v598_v18  ;;  %v605_v23 = vunpack.i.h.bf16 %v603_v19  ;;  %v604_v24 = vunpack.i.l.bf16 %v603_v19 }
 0x184   :  { %v611_v25 = vpack.i.bf16 %v144_v17, %v143_v20  ;;  %v46_v15 = vand.u32 127, %v45_v14 }
 0x185   :  { %v142_v26 = vsel %vm134_vm8, %v600_v21, 0.0  ;;  %v136_v27 = vsel %vm134_vm8, %v599_v22, %v600_v21  ;;  %v235_v28 = vsel %vm134_vm8, 0.0, %v604_v24  ;;  %v229_v29 = vsel %vm134_vm8, %v604_v24, %v605_v23 }
 0x186   :  { %v146_v30 = vmax.f32 %v121_v62, %v142_v26  ;;  %v608_v31 = vpop.permute.xlu1 %607  ;;  %612 = vrot.lane.b32.xlu0 %v611_v25, %s763_s1  ;;  %v145_v32 = vmax.f32 %v120_v1, %v136_v27  ;;  %v237_v33 = vmax.f32 %v213_v63, %v235_v28  ;;  %v238_v34 = vmax.f32 %v214_v2, %v229_v29 }
 0x187   :  { %v610_v35 = vunpack.i.h.bf16 %v608_v31  ;;  %v609_v36 = vunpack.i.l.bf16 %v608_v31  ;;  %v47_v16 = vadd.s32 128, %v46_v15  ;;  %v853_v18 = vand.u32 15, %v46_v15 }
 0x188   :  { %v616_v37 = vpack.i.bf16 %v146_v30, %v145_v32  ;;  %v621_v38 = vpack.i.bf16 %v238_v34, %v237_v33 }
 0x189   :  { %v236_v39 = vsel %vm134_vm8, 0.0, %v609_v36  ;;  %v230_v40 = vsel %vm134_vm8, %v609_v36, %v610_v35  ;;  %vm290_vm11 = vcmp.lt.s32.totalorder %v853_v18, 15  ;;  %vm407_vm13 = vcmp.ge.s32.totalorder %v853_v18, 1 }
 0x18a   :  { %617 = vrot.lane.b32.xlu1 %v616_v37, %s763_s1  ;;  %622 = vrot.lane.b32.xlu0 %v621_v38, %s761_s20  ;;  %v239_v41 = vmax.f32 %v215_v9, %v236_v39  ;;  %v240_v42 = vmax.f32 %v216_v10, %v230_v40  ;;  %vm321_vm1 = vcmp.lt.s32.totalorder %v853_v18, 14  ;;  %vm438_vm3 = vcmp.ge.s32.totalorder %v853_v18, 2 }
 0x18b   :  { %vm352_vm7 = vcmp.lt.s32.totalorder %v853_v18, 12  ;;  %vm460_vm8 = vcmask 31744  }
 0x18c   :  { %v626_v43 = vpack.i.bf16 %v240_v42, %v239_v41 }
 0x18e   :  { %627 = vrot.lane.b32.xlu1 %v626_v43, %s761_s20 }
 0x1f8   :  { %v613_v44 = vpop.permute.xlu0 %612 }
 0x1f9   :  { %v615_v45 = vunpack.i.h.bf16 %v613_v44  ;;  %v614_v46 = vunpack.i.l.bf16 %v613_v44 }
 0x1fb   :  { %v165_v47 = vsel %vm84_vm4, %v615_v45, 0.0  ;;  %v159_v48 = vsel %vm84_vm4, %v614_v46, %v615_v45 }
 0x1fc   :  { %v618_v49 = vpop.permute.xlu1 %617  ;;  %v623_v50 = vpop.permute.xlu0 %622  ;;  %v168_v55 = vmax.f32 %v144_v17, %v165_v47  ;;  %v167_v58 = vmax.f32 %v143_v20, %v159_v48  ;;  %v851_v17 = vand.u32 15, %v47_v16 }
 0x1fd   :  { %v620_v51 = vunpack.i.h.bf16 %v618_v49  ;;  %v619_v52 = vunpack.i.l.bf16 %v618_v49  ;;  %v625_v53 = vunpack.i.h.bf16 %v623_v50  ;;  %v624_v54 = vunpack.i.l.bf16 %v623_v50 }
 0x1fe   :  { %vm291_vm10 = vcmp.lt.s32.totalorder %v851_v17, 15  ;;  %vm408_vm14 = vcmp.ge.s32.totalorder %v851_v17, 1  ;;  %vm322_vm0 = vcmp.lt.s32.totalorder %v851_v17, 14  ;;  %vm353_vm6 = vcmp.lt.s32.totalorder %v851_v17, 12 }
 0x1ff   :  { %v253_v56 = vsel %vm179_vm5, %v624_v54, %v625_v53  ;;  %v259_v57 = vsel %vm179_vm5, 0.0, %v624_v54  ;;  %v166_v59 = vsel %vm84_vm4, %v620_v51, 0.0  ;;  %v160_v63 = vsel %vm84_vm4, %v619_v52, %v620_v51 }
 0x200   :  { %v261_v60 = vmax.f32 %v237_v33, %v259_v57  ;;  %v262_v61 = vmax.f32 %v238_v34, %v253_v56  ;;  %v628_v62 = vpop.permute.xlu1 %627  ;;  %v170_v4 = vmax.f32 %v146_v30, %v166_v59  ;;  %v169_v7 = vmax.f32 %v145_v32, %v160_v63 }
 0x201   :  { %v630_v0 = vunpack.i.h.bf16 %v628_v62  ;;  %v629_v1 = vunpack.i.l.bf16 %v628_v62  ;;  %vm439_vm4 = vcmp.ge.s32.totalorder %v851_v17, 2 }
 0x202   :  { %v265_v2 = vmax.f32 %v167_v58, %v261_v60  ;;  %v266_v3 = vmax.f32 %v168_v55, %v262_v61 }
 0x203   :  { %v254_v5 = vsel %vm179_vm5, %v629_v1, %v630_v0  ;;  %v260_v6 = vsel %vm179_vm5, 0.0, %v629_v1  ;;  %vm343_vm5 = vcmask 1014784  }
 0x204   :  { %v263_v8 = vmax.f32 %v239_v41, %v260_v6  ;;  %v264_v9 = vmax.f32 %v240_v42, %v254_v5  ;;  %v631_v10 = vpack.i.bf16 %v266_v3, %v265_v2 }
 0x206   :  { %v267_v11 = vmax.f32 %v169_v7, %v263_v8  ;;  %v268_v12 = vmax.f32 %v170_v4, %v264_v9  ;;  %632 = vrot.lane.b32.xlu0 %v631_v10, %s767_s27 }
 0x208   :  { %v636_v13 = vpack.i.bf16 %v268_v12, %v267_v11 }
 0x20a   :  { %637 = vrot.lane.b32.xlu1 %v636_v13, %s767_s27  ;;  %642 = vrot.lane.b32.xlu0 %v631_v10, %s768_s28 }
 0x20e   :  { %647 = vrot.lane.b32.xlu1 %v636_v13, %s768_s28 }
 0x278   :  { %v633_v19 = vpop.permute.xlu0 %632 }
 0x279   :  { %v635_v20 = vunpack.i.h.bf16 %v633_v19  ;;  %v634_v21 = vunpack.i.l.bf16 %v633_v19 }
 0x27b   :  { %v288_v22 = vsel %vm281_vm9, %v635_v20, 0.0  ;;  %v282_v23 = vsel %vm281_vm9, %v634_v21, %v635_v20 }
 0x27c   :  { %v293_v24 = vsel %vm291_vm10, %v288_v22, 0.0  ;;  %v638_v25 = vpop.permute.xlu1 %637  ;;  %v643_v26 = vpop.permute.xlu0 %642  ;;  %v292_v27 = vsel %vm290_vm11, %v282_v23, 0.0 }
 0x27d   :  { %v297_v28 = vmax.f32 %v266_v3, %v293_v24  ;;  %v640_v29 = vunpack.i.h.bf16 %v638_v25  ;;  %v639_v30 = vunpack.i.l.bf16 %v638_v25  ;;  %v645_v31 = vunpack.i.h.bf16 %v643_v26 }
 0x27e   :  { %v644_v32 = vunpack.i.l.bf16 %v643_v26  ;;  %v296_v33 = vmax.f32 %v265_v2, %v292_v27 }
 0x27f   :  { %v289_v34 = vsel %vm281_vm9, %v640_v29, 0.0  ;;  %v283_v35 = vsel %vm281_vm9, %v639_v30, %v640_v29 }
 0x280   :  { %v295_v36 = vsel %vm291_vm10, %v289_v34, 0.0  ;;  %v399_v37 = vsel %vm398_vm12, %v644_v32, %v645_v31  ;;  %v405_v38 = vsel %vm398_vm12, 0.0, %v644_v32  ;;  %v648_v39 = vpop.permute.xlu1 %647  ;;  %v651_v40 = vpack.i.bf16 %v297_v28, %v296_v33 }
 0x281   :  { %v299_v41 = vmax.f32 %v268_v12, %v295_v36  ;;  %v409_v42 = vsel %vm407_vm13, %v405_v38, 0.0  ;;  %v650_v43 = vunpack.i.h.bf16 %v648_v39  ;;  %v649_v44 = vunpack.i.l.bf16 %v648_v39 }
 0x282   :  { %v413_v45 = vmax.f32 %v265_v2, %v409_v42  ;;  %652 = vrot.lane.b32.xlu0 %v651_v40, %s769_s29  ;;  %v294_v46 = vsel %vm290_vm11, %v283_v35, 0.0  ;;  %v410_v47 = vsel %vm408_vm14, %v399_v37, 0.0 }
 0x283   :  { %v400_v48 = vsel %vm398_vm12, %v649_v44, %v650_v43  ;;  %v406_v49 = vsel %vm398_vm12, 0.0, %v649_v44  ;;  %v298_v50 = vmax.f32 %v267_v11, %v294_v46  ;;  %v414_v51 = vmax.f32 %v266_v3, %v410_v47 }
 0x284   :  { %v411_v52 = vsel %vm407_vm13, %v406_v49, 0.0  ;;  %v412_v53 = vsel %vm408_vm14, %v400_v48, 0.0 }
 0x285   :  { %v415_v54 = vmax.f32 %v267_v11, %v411_v52  ;;  %v656_v55 = vpack.i.bf16 %v299_v41, %v298_v50  ;;  %v661_v56 = vpack.i.bf16 %v414_v51, %v413_v45  ;;  %v416_v57 = vmax.f32 %v268_v12, %v412_v53 }
 0x287   :  { %657 = vrot.lane.b32.xlu1 %v656_v55, %s769_s29  ;;  %662 = vrot.lane.b32.xlu0 %v661_v56, %s770_s30  ;;  %v666_v58 = vpack.i.bf16 %v416_v57, %v415_v54 }
 0x28b   :  { %667 = vrot.lane.b32.xlu1 %v666_v58, %s770_s30 }
 0x2f4   :  { %v653_v59 = vpop.permute.xlu0 %652 }
 0x2f5   :  { %v655_v60 = vunpack.i.h.bf16 %v653_v59  ;;  %v654_v61 = vunpack.i.l.bf16 %v653_v59 }
 0x2f7   :  { %v319_v62 = vsel %vm312_vm15, %v655_v60, 0.0  ;;  %v313_v63 = vsel %vm312_vm15, %v654_v61, %v655_v60 }
 0x2f8   :  { %v324_v0 = vsel %vm322_vm0, %v319_v62, 0.0  ;;  %v323_v1 = vsel %vm321_vm1, %v313_v63, 0.0 }
 0x2f9   :  { %v328_v2 = vmax.f32 %v297_v28, %v324_v0  ;;  %v658_v3 = vpop.permute.xlu1 %657  ;;  %v663_v4 = vpop.permute.xlu0 %662  ;;  %v327_v5 = vmax.f32 %v296_v33, %v323_v1 }
 0x2fa   :  { %v660_v6 = vunpack.i.h.bf16 %v658_v3  ;;  %v659_v7 = vunpack.i.l.bf16 %v658_v3  ;;  %v665_v8 = vunpack.i.h.bf16 %v663_v4  ;;  %v664_v9 = vunpack.i.l.bf16 %v663_v4 }
 0x2fb   :  { %v671_v10 = vpack.i.bf16 %v328_v2, %v327_v5 }
 0x2fc   :  { %v320_v11 = vsel %vm312_vm15, %v660_v6, 0.0  ;;  %v314_v12 = vsel %vm312_vm15, %v659_v7, %v660_v6  ;;  %v430_v13 = vsel %vm429_vm2, %v664_v9, %v665_v8  ;;  %v436_v14 = vsel %vm429_vm2, 0.0, %v664_v9 }
 0x2fd   :  { %v326_v15 = vsel %vm322_vm0, %v320_v11, 0.0  ;;  %v440_v16 = vsel %vm438_vm3, %v436_v14, 0.0  ;;  %v668_v19 = vpop.permute.xlu1 %667  ;;  %672 = vrot.lane.b32.xlu0 %v671_v10, %s771_s3  ;;  %v325_v20 = vsel %vm321_vm1, %v314_v12, 0.0  ;;  %v441_v21 = vsel %vm439_vm4, %v430_v13, 0.0 }
 0x2fe   :  { %v330_v22 = vmax.f32 %v299_v41, %v326_v15  ;;  %v444_v23 = vmax.f32 %v413_v45, %v440_v16  ;;  %v670_v24 = vunpack.i.h.bf16 %v668_v19  ;;  %v669_v25 = vunpack.i.l.bf16 %v668_v19 }
 0x2ff   :  { %v329_v26 = vmax.f32 %v298_v50, %v325_v20  ;;  %v445_v27 = vmax.f32 %v414_v51, %v441_v21  ;;  %vm469_vm15 = vcmp.ge.s32.totalorder %v853_v18, 4  ;;  %vm470_vm0 = vcmp.ge.s32.totalorder %v851_v17, 4 }
 0x300   :  { %v431_v28 = vsel %vm429_vm2, %v669_v25, %v670_v24  ;;  %v437_v29 = vsel %vm429_vm2, 0.0, %v669_v25 }
 0x301   :  { %v442_v30 = vsel %vm438_vm3, %v437_v29, 0.0  ;;  %v676_v31 = vpack.i.bf16 %v330_v22, %v329_v26  ;;  %v681_v32 = vpack.i.bf16 %v445_v27, %v444_v23  ;;  %v443_v33 = vsel %vm439_vm4, %v431_v28, 0.0 }
 0x302   :  { %v446_v34 = vmax.f32 %v415_v54, %v442_v30  ;;  %v447_v35 = vmax.f32 %v416_v57, %v443_v33 }
 0x303   :  { %677 = vrot.lane.b32.xlu1 %v676_v31, %s771_s3  ;;  %682 = vrot.lane.b32.xlu0 %v681_v32, %s772_s4 }
 0x304   :  { %v686_v36 = vpack.i.bf16 %v447_v35, %v446_v34 }
 0x307   :  { %687 = vrot.lane.b32.xlu1 %v686_v36, %s772_s4 }
 0x36f   :  { %v673_v37 = vpop.permute.xlu0 %672 }
 0x370   :  { %v675_v38 = vunpack.i.h.bf16 %v673_v37  ;;  %v674_v39 = vunpack.i.l.bf16 %v673_v37 }
 0x372   :  { %v350_v40 = vsel %vm343_vm5, %v675_v38, 0.0  ;;  %v344_v41 = vsel %vm343_vm5, %v674_v39, %v675_v38 }
 0x373   :  { %v355_v42 = vsel %vm353_vm6, %v350_v40, 0.0  ;;  %v354_v43 = vsel %vm352_vm7, %v344_v41, 0.0 }
 0x374   :  { %v919_v44 = vmax.f32 %v328_v2, %v355_v42  ;;  %v921_v45 = vmax.f32 %v327_v5, %v354_v43 }
 0x375   :  { %v678_v46 = vpop.permute.xlu1 %677  ;;  %v683_v47 = vpop.permute.xlu0 %682 }
 0x376   :  { %v680_v48 = vunpack.i.h.bf16 %v678_v46  ;;  %v679_v49 = vunpack.i.l.bf16 %v678_v46  ;;  %v685_v50 = vunpack.i.h.bf16 %v683_v47  ;;  %v684_v51 = vunpack.i.l.bf16 %v683_v47 }
 0x377   :  { %v691_v52 = vpack.i.bf16 %v919_v44, %v921_v45 }
 0x378   :  { %v351_v53 = vsel %vm343_vm5, %v680_v48, 0.0  ;;  %v345_v54 = vsel %vm343_vm5, %v679_v49, %v680_v48  ;;  %v461_v55 = vsel %vm460_vm8, %v684_v51, %v685_v50  ;;  %v467_v56 = vsel %vm460_vm8, 0.0, %v684_v51 }
 0x379   :  { %v357_v57 = vsel %vm353_vm6, %v351_v53, 0.0  ;;  %v471_v58 = vsel %vm469_vm15, %v467_v56, 0.0  ;;  %v688_v59 = vpop.permute.xlu1 %687  ;;  %692 = vrot.lane.b32.xlu0 %v691_v52, %s767_s27  ;;  %v356_v60 = vsel %vm352_vm7, %v345_v54, 0.0  ;;  %v472_v61 = vsel %vm470_vm0, %v461_v55, 0.0 }
 0x37a   :  { %v361_v62 = vmax.f32 %v330_v22, %v357_v57  ;;  %v475_v63 = vmax.f32 %v444_v23, %v471_v58  ;;  %v690_v0 = vunpack.i.h.bf16 %v688_v59  ;;  %v689_v1 = vunpack.i.l.bf16 %v688_v59 }
 0x37b   :  { %v360_v2 = vmax.f32 %v329_v26, %v356_v60  ;;  %v476_v3 = vmax.f32 %v445_v27, %v472_v61 }
 0x37c   :  { %v462_v4 = vsel %vm460_vm8, %v689_v1, %v690_v0  ;;  %v468_v5 = vsel %vm460_vm8, 0.0, %v689_v1 }
 0x37d   :  { %v473_v6 = vsel %vm469_vm15, %v468_v5, 0.0  ;;  %v696_v7 = vpack.i.bf16 %v361_v62, %v360_v2  ;;  %v701_v8 = vpack.i.bf16 %v476_v3, %v475_v63  ;;  %v474_v9 = vsel %vm470_vm0, %v462_v4, 0.0 }
 0x37e   :  { %v477_v10 = vmax.f32 %v446_v34, %v473_v6  ;;  %v478_v11 = vmax.f32 %v447_v35, %v474_v9 }
 0x37f   :  { %697 = vrot.lane.b32.xlu1 %v696_v7, %s767_s27  ;;  %702 = vrot.lane.b32.xlu0 %v701_v8, %s768_s28 }
 0x380   :  { %v706_v12 = vpack.i.bf16 %v478_v11, %v477_v10 }
 0x383   :  { %707 = vrot.lane.b32.xlu1 %v706_v12, %s768_s28 }
 0x3eb   :  { %v693_v13 = vpop.permute.xlu0 %692 }
 0x3ec   :  { %v695_v14 = vunpack.i.h.bf16 %v693_v13  ;;  %v694_v15 = vunpack.i.l.bf16 %v693_v13 }
 0x3ee   :  { %v380_v16 = vsel %vm281_vm9, %v695_v14, 0.0  ;;  %v374_v19 = vsel %vm281_vm9, %v694_v15, %v695_v14 }
 0x3ef   :  { %v383_v26 = vsel %vm291_vm10, %v380_v16, 0.0  ;;  %v382_v27 = vsel %vm290_vm11, %v374_v19, 0.0 }
 0x3f0   :  { %v387_v35 = vmax.f32 %v919_v44, %v383_v26  ;;  %v386_v36 = vmax.f32 %v921_v45, %v382_v27 }
 0x3f1   :  { %v698_v20 = vpop.permute.xlu1 %697  ;;  %v703_v21 = vpop.permute.xlu0 %702 }
 0x3f2   :  { %v700_v22 = vunpack.i.h.bf16 %v698_v20  ;;  %v699_v23 = vunpack.i.l.bf16 %v698_v20  ;;  %v705_v24 = vunpack.i.h.bf16 %v703_v21  ;;  %v704_v25 = vunpack.i.l.bf16 %v703_v21 }
 0x3f4   :  { %v491_v28 = vsel %vm398_vm12, %v704_v25, %v705_v24  ;;  %v497_v29 = vsel %vm398_vm12, 0.0, %v704_v25  ;;  %v381_v30 = vsel %vm281_vm9, %v700_v22, 0.0  ;;  %v375_v31 = vsel %vm281_vm9, %v699_v23, %v700_v22 }
 0x3f5   :  { %v499_v32 = vsel %vm407_vm13, %v497_v29, 0.0  ;;  %v500_v33 = vsel %vm408_vm14, %v491_v28, 0.0  ;;  %v708_v34 = vpop.permute.xlu1 %707  ;;  %v385_v41 = vsel %vm291_vm10, %v381_v30, 0.0  ;;  %v384_v42 = vsel %vm290_vm11, %v375_v31, 0.0 }
 0x3f6   :  { %v503_v37 = vmax.f32 %v475_v63, %v499_v32  ;;  %v504_v38 = vmax.f32 %v476_v3, %v500_v33  ;;  %v710_v39 = vunpack.i.h.bf16 %v708_v34  ;;  %v709_v40 = vunpack.i.l.bf16 %v708_v34 }
 0x3f7   :  { %v389_v49 = vmax.f32 %v361_v62, %v385_v41  ;;  %v388_v50 = vmax.f32 %v360_v2, %v384_v42 }
 0x3f8   :  { %v507_v43 = vmax.f32 %v386_v36, %v503_v37  ;;  %v508_v46 = vmax.f32 %v387_v35, %v504_v38  ;;  %v492_v47 = vsel %vm398_vm12, %v709_v40, %v710_v39  ;;  %v498_v48 = vsel %vm398_vm12, 0.0, %v709_v40 }
 0x3f9   :  { %v501_v44 = vsel %vm407_vm13, %v498_v48, 0.0  ;;  %v502_v45 = vsel %vm408_vm14, %v492_v47, 0.0 }
 0x3fa   :  { %511 = vst [vmem:[#allocation6] sm:$0xff] %v507_v43  ;;  %512 = vst [vmem:[#allocation6 + $0x8] sm:$0xff] %v508_v46  ;;  %v505_v51 = vmax.f32 %v477_v10, %v501_v44  ;;  %v506_v52 = vmax.f32 %v478_v11, %v502_v45 }
 0x3fc   :  { %v509_v53 = vmax.f32 %v388_v50, %v505_v51  ;;  %v510_v54 = vmax.f32 %v389_v49, %v506_v52 }
 0x3fe   :  { %513 = vst [vmem:[#allocation6 + $0x10] sm:$0xff] %v509_v53  ;;  %514 = vst [vmem:[#allocation6 + $0x18] sm:$0xff] %v510_v54 }
 0x3ff   :  { %744 = shalt.err (!%p741_p12)
}
 0x400   :  { %s745_s10 = scalar_lea.hbm %s992_s2, 512 }
 0x401   :  { %p746_p13 = scmp.ne.s32.totalorder %s992_s2, %s745_s10  ;;  %p749_p0 = scmp.lt.u32.totalorder %s745_s10, %s992_s2 }
 0x403   :  { %p751_p1 = pnand %p749_p0, %p746_p13 }
 0x405   :  { %754 = shalt.err (!%p751_p1)
}
 0x406   :  { %526 = dma.vmem_to_hbm [thread:$0]  %s521_s6, 512, %s992_s2, [#allocation5], %s760_s19, %s760_s19, %s761_s20  }
 0x407   :  { %757 = dma.done.wait [#allocation5], 512  }
 0x408   :  { %758 = vsyncadd [#allocation5], 4294966784 }
 0x409   :  { %530 = vsyncpa [#allocation4], 1 }
 0x40a   :  { %531 = vsyncpa [#allocation5], 1 }

</bundles_post_ra>
